<compile_context>
chip_gen: v7x
topology: tpu7x:2x2x1
jax: 0.10.0
libtpu: 0.0.40
codegen_flags: <defaults>
</compile_context>

<pallas_src>
import functools

import jax
import jax.numpy as jnp
from jax import lax
from jax.experimental import pallas as pl
from jax.experimental.pallas import tpu as pltpu

_LANE = 128
_SUBLANE = 8
_VMEM_LIMIT = 48 * 1024 * 1024  # fits v5e/v6e (128 MiB) and v7x (64 MiB) VMEM


def _round_up(x, m):
    return (x + m - 1) // m * m


# ----------------------------- Pallas kernels -------------------------------

def _conv_mm_stats_kernel(p_ref, w_ref, acc_ref, psum_ref, psq_ref):
    """Pass 1: conv-as-matmul for one M tile + per-tile channel sum / sumsq."""
    acc = jnp.dot(p_ref[...], w_ref[...],
                  preferred_element_type=jnp.float32)           # [TM, Cp]  (MXU)
    acc_ref[...] = acc
    s = jnp.sum(acc, axis=0, keepdims=True)                     # [1, Cp]   (XLU)
    sq = jnp.sum(acc * acc, axis=0, keepdims=True)              # [1, Cp]
    psum_ref[...] = s[None]                                     # [1, 1, Cp]
    psq_ref[...] = sq[None]


def _bn_lrelu_kernel(acc_ref, scale_ref, shift_ref, o_ref, *, neg_slope):
    """Pass 2: per-element FMA (folded BN) + LeakyReLU over one M tile."""
    y = acc_ref[...] * scale_ref[...] + shift_ref[...]
    o_ref[...] = jnp.where(y > 0, y, neg_slope * y)


def _conv_mm_lrelu_kernel(p_ref, w_ref, o_ref, *, neg_slope):
    """normalize=False path: fused matmul + LeakyReLU."""
    acc = jnp.dot(p_ref[...], w_ref[...], preferred_element_type=jnp.float32)
    o_ref[...] = jnp.where(acc > 0, acc, neg_slope * acc)


# ------------------------------- JAX glue ------------------------------------

def _im2col(x, kh, kw, stride, pad):
    """x: [N, C, H, W] -> patches [N*OH*OW, C*kh*kw] (PyTorch weight K ordering)."""
    n, c, h, w = x.shape
    xp = jnp.pad(x, ((0, 0), (0, 0), (pad, pad), (pad, pad)))
    oh = (h + 2 * pad - kh) // stride + 1
    ow = (w + 2 * pad - kw) // stride + 1
    cols = []
    for i in range(kh):
        for j in range(kw):
            cols.append(xp[:, :, i:i + stride * oh:stride, j:j + stride * ow:stride])
    # K index = c*(kh*kw) + i*kw + j  (matches PyTorch weight.reshape(Cout, -1))
    patches = jnp.stack(cols, axis=2)                           # [N, C, kh*kw, OH, OW]
    patches = patches.reshape(n, c * kh * kw, oh, ow)
    patches = jnp.transpose(patches, (0, 2, 3, 1)).reshape(n * oh * ow, c * kh * kw)
    return patches, oh, ow


class CNN:
    """JAX/Pallas equivalent of the PyTorch CNN block."""

    def __init__(self, in_channels, out_channels, stride, normalize=True, key=None):
        if key is None:
            key = jax.random.PRNGKey(0)
        self.in_channels = in_channels
        self.out_channels = out_channels
        self.stride = stride
        self.normalize = normalize
        # Conv2d weight, PyTorch layout [Cout, Cin, 4, 4], deterministic init.
        self.weight = 0.1 * jax.random.normal(
            key, (out_channels, in_channels, 4, 4), dtype=jnp.float32)
        # BatchNorm2d affine params (PyTorch defaults: weight=1, bias=0).
        self.gamma = jnp.ones((1, out_channels), dtype=jnp.float32)
        self.beta = jnp.zeros((1, out_channels), dtype=jnp.float32)

    def __call__(self, x):
        return _forward(x, self.weight, self.gamma, self.beta,
                        self.stride, self.normalize)


@functools.partial(jax.jit, static_argnums=(4, 5))
def _forward(x, weight, gamma, beta, stride, normalize):
    n, c_in, h, w = x.shape
    c_out = weight.shape[0]
    kh = kw = 4
    pad = 1
    eps = 1e-5
    neg_slope = 0.2

    # im2col with bf16 MXU operands (f32 accumulate inside the kernel).
    patches, oh, ow = _im2col(x.astype(jnp.bfloat16), kh, kw, stride, pad)  # [M, K]
    k = c_in * kh * kw
    m = n * oh * ow

    # Lane-dense output: pad Cout up to a multiple of 128 (sliced off afterwards).
    c_pad = _round_up(c_out, _LANE)
    w2d = weight.reshape(c_out, k).T.astype(jnp.bfloat16)                   # [K, Cout]
    w2d = jnp.pad(w2d, ((0, 0), (0, c_pad - c_out)))                        # [K, Cp]

    # Tile M; padded (zero) rows contribute 0 to sum/sumsq so stats stay exact.
    tm = min(512, _round_up(m, _SUBLANE))
    m_pad = _round_up(m, tm)
    patches = jnp.pad(patches, ((0, m_pad - m), (0, 0)))
    grid_m = m_pad // tm

    patches_spec = pl.BlockSpec((tm, k), lambda i: (i, 0))
    w_spec = pl.BlockSpec((k, c_pad), lambda i: (0, 0))
    row_spec = pl.BlockSpec((tm, c_pad), lambda i: (i, 0))
    chan_spec = pl.BlockSpec((1, c_pad), lambda i: (0, 0))
    stat_spec = pl.BlockSpec((1, 1, c_pad), lambda i: (i, 0, 0))

    if normalize:
        # ---- pass 1: tiled matmul + per-tile sum / sumsq (fully 'parallel') ----
        mm_cost = pl.CostEstimate(
            flops=2 * m_pad * k * c_pad,
            transcendentals=0,
            bytes_accessed=(patches.size * 2 + w2d.size * 2
                            + m_pad * c_pad * 4 + 2 * grid_m * c_pad * 4))
        acc, psum, psq = pl.pallas_call(
            _conv_mm_stats_kernel,
            grid=(grid_m,),
            in_specs=[patches_spec, w_spec],
            out_specs=(row_spec, stat_spec, stat_spec),
            out_shape=(jax.ShapeDtypeStruct((m_pad, c_pad), jnp.float32),
                       jax.ShapeDtypeStruct((grid_m, 1, c_pad), jnp.float32),
                       jax.ShapeDtypeStruct((grid_m, 1, c_pad), jnp.float32)),
            compiler_params=pltpu.CompilerParams(
                dimension_semantics=("parallel",),
                vmem_limit_bytes=_VMEM_LIMIT),
            cost_estimate=mm_cost,
        )(patches, w2d)

        # ---- tiny XLA step: finalize BN stats on [Cp] vectors, fold gamma/beta ----
        ch_sum = jnp.sum(psum[:, 0, :], axis=0)                 # [Cp]
        ch_sumsq = jnp.sum(psq[:, 0, :], axis=0)                # [Cp]
        mean = ch_sum / m
        var = ch_sumsq / m - mean * mean                        # biased batch var
        gamma_p = jnp.pad(gamma.astype(jnp.float32), ((0, 0), (0, c_pad - c_out)))
        beta_p = jnp.pad(beta.astype(jnp.float32), ((0, 0), (0, c_pad - c_out)))
        scale = gamma_p * lax.rsqrt(var + eps)[None, :]         # [1, Cp]
        shift = beta_p - mean[None, :] * scale                  # [1, Cp]

        # ---- pass 2: folded BN (single FMA) + LeakyReLU ('parallel') ----
        bn_cost = pl.CostEstimate(
            flops=4 * m_pad * c_pad,
            transcendentals=0,
            bytes_accessed=2 * m_pad * c_pad * 4 + 2 * c_pad * 4)
        out = pl.pallas_call(
            functools.partial(_bn_lrelu_kernel, neg_slope=neg_slope),
            grid=(grid_m,),
            in_specs=[row_spec, chan_spec, chan_spec],
            out_specs=row_spec,
            out_shape=jax.ShapeDtypeStruct((m_pad, c_pad), jnp.float32),
            compiler_params=pltpu.CompilerParams(
                dimension_semantics=("parallel",),
                vmem_limit_bytes=_VMEM_LIMIT),
            cost_estimate=bn_cost,
        )(acc, scale, shift)
    else:
        # ---- single fused pass: matmul + LeakyReLU ('parallel') ----
        mm_cost = pl.CostEstimate(
            flops=2 * m_pad * k * c_pad,
            transcendentals=0,
            bytes_accessed=(patches.size * 2 + w2d.size * 2 + m_pad * c_pad * 4))
        out = pl.pallas_call(
            functools.partial(_conv_mm_lrelu_kernel, neg_slope=neg_slope),
            grid=(grid_m,),
            in_specs=[patches_spec, w_spec],
            out_specs=row_spec,
            out_shape=jax.ShapeDtypeStruct((m_pad, c_pad), jnp.float32),
            compiler_params=pltpu.CompilerParams(
                dimension_semantics=("parallel",),
                vmem_limit_bytes=_VMEM_LIMIT),
            cost_estimate=mm_cost,
        )(patches, w2d)

    # Strip padding; [M, Cout] -> [N, OH, OW, Cout] -> NCHW (PyTorch interface).
    out = out[:m, :c_out].reshape(n, oh, ow, c_out)
    return jnp.transpose(out, (0, 3, 1, 2))


# ------------------------------ reference ------------------------------------

def _reference(x, weight, gamma, beta, stride, normalize):
    # Match the Pallas path's bf16 MXU operands (f32 accumulation).
    xb = x.astype(jnp.bfloat16).astype(jnp.float32)
    wb = weight.astype(jnp.bfloat16).astype(jnp.float32)
    y = lax.conv_general_dilated(
        xb, wb, window_strides=(stride, stride), padding=((1, 1), (1, 1)),
        dimension_numbers=("NCHW", "OIHW", "NCHW"),
        precision=lax.Precision.HIGHEST)
    if normalize:
        mean = jnp.mean(y, axis=(0, 2, 3), keepdims=True)
        var = jnp.mean((y - mean) ** 2, axis=(0, 2, 3), keepdims=True)
        y = (y - mean) * lax.rsqrt(var + 1e-5)
        y = y * gamma.reshape(1, -1, 1, 1) + beta.reshape(1, -1, 1, 1)
    return jnp.where(y > 0, y, 0.2 * y)


# --------------------------------- main ---------------------------------------

if __name__ == "__main__":
    key = jax.random.PRNGKey(0)
    kx, kw_ = jax.random.split(key)

    batch, in_ch, out_ch, hw, stride = 2, 4, 8, 16, 2
    x = jax.random.normal(kx, (batch, in_ch, hw, hw), dtype=jnp.float32)

    # normalize=True branch (Conv -> BatchNorm -> LeakyReLU)
    block = CNN(in_ch, out_ch, stride, normalize=True, key=kw_)
    out = jax.block_until_ready(block(x))
    ref = _reference(x, block.weight, block.gamma, block.beta, stride, True)
    assert out.shape == (batch, out_ch, hw // stride, hw // stride), out.shape
    assert jnp.allclose(out, ref, atol=1e-2, rtol=1e-2), (
        "mismatch vs reference", float(jnp.max(jnp.abs(out - ref))))

    # normalize=False branch (Conv -> LeakyReLU)
    block_nn = CNN(in_ch, out_ch, stride, normalize=False, key=kw_)
    out_nn = jax.block_until_ready(block_nn(x))
    ref_nn = _reference(x, block_nn.weight, block_nn.gamma, block_nn.beta, stride, False)
    assert jnp.allclose(out_nn, ref_nn, atol=1e-2, rtol=1e-2), (
        "mismatch vs reference", float(jnp.max(jnp.abs(out_nn - ref_nn))))

    print("KERNEL_OK")
</pallas_src>

<mosaic_0001>
module attributes {stable_mosaic.version = 11 : i64} {
  func.func @_conv_mm_stats_kernel(%arg0: i32, %arg1: memref<128x64xbf16, #tpu.memory_space<vmem>>, %arg2: memref<64x128xbf16, #tpu.memory_space<vmem>>, %arg3: memref<128x128xf32, #tpu.memory_space<vmem>>, %arg4: memref<1x1x128xf32, #tpu.memory_space<vmem>>, %arg5: memref<1x1x128xf32, #tpu.memory_space<vmem>>) attributes {dimension_semantics = [#tpu.dimension_semantics<parallel>], iteration_bounds = array<i64: 1>, scalar_prefetch = 0 : i64, scratch_operands = 0 : i64, tpu.core_type = #tpu.core_type<tc>, window_params = [{transform_indices = @transform_0, window_bounds = array<i64: 128, 64>}, {pipeline_mode = #tpu.pipeline_mode<synchronous>, transform_indices = @transform_1, window_bounds = array<i64: 64, 128>}, {transform_indices = @transform_2, window_bounds = array<i64: 128, 128>}, {transform_indices = @transform_3, window_bounds = array<i64: 1, 1, 128>}, {transform_indices = @transform_4, window_bounds = array<i64: 1, 1, 128>}]} {
    %c0 = arith.constant 0 : index
    %c0_0 = arith.constant 0 : index
    %0 = vector.load %arg1[%c0, %c0_0] : memref<128x64xbf16, #tpu.memory_space<vmem>>, vector<128x64xbf16>
    %c0_1 = arith.constant 0 : index
    %c0_2 = arith.constant 0 : index
    %1 = vector.load %arg2[%c0_1, %c0_2] : memref<64x128xbf16, #tpu.memory_space<vmem>>, vector<64x128xbf16>
    %cst = arith.constant dense<0.000000e+00> : vector<128x128xf32>
    %2 = tpu.matmul %0, %1, %cst {dimension_numbers = #tpu.dot_dimension_numbers<[1], [0], [0], [1], [0, 0, 1, 1], [], []>} : vector<128x64xbf16>, vector<64x128xbf16>, vector<128x128xf32> -> vector<128x128xf32>
    %c0_3 = arith.constant 0 : index
    %c0_4 = arith.constant 0 : index
    %3 = vector.load %arg3[%c0_3, %c0_4] : memref<128x128xf32, #tpu.memory_space<vmem>>, vector<128x128xf32>
    tpu.vector_store %arg3[%c0_3, %c0_4], %2 {strides = array<i32>} : memref<128x128xf32, #tpu.memory_space<vmem>>, vector<128x128xf32>,
    %cst_5 = arith.constant dense<0.000000e+00> : vector<128xf32>
    %4 = vector.multi_reduction <add>, %2, %cst_5 [0] : vector<128x128xf32> to vector<128xf32>
    %5 = vector.shape_cast %4 : vector<128xf32> to vector<1x128xf32>
    %6 = arith.mulf %2, %2 : vector<128x128xf32>
    %cst_6 = arith.constant dense<0.000000e+00> : vector<128xf32>
    %7 = vector.multi_reduction <add>, %6, %cst_6 [0] : vector<128x128xf32> to vector<128xf32>
    %8 = vector.shape_cast %7 : vector<128xf32> to vector<1x128xf32>
    %9 = vector.shape_cast %5 : vector<1x128xf32> to vector<1x1x128xf32>
    %c0_7 = arith.constant 0 : index
    %c0_8 = arith.constant 0 : index
    %c0_9 = arith.constant 0 : index
    %10 = vector.load %arg4[%c0_7, %c0_8, %c0_9] : memref<1x1x128xf32, #tpu.memory_space<vmem>>, vector<1x1x128xf32>
    tpu.vector_store %arg4[%c0_7, %c0_8, %c0_9], %9 {strides = array<i32>} : memref<1x1x128xf32, #tpu.memory_space<vmem>>, vector<1x1x128xf32>,
    %11 = vector.shape_cast %8 : vector<1x128xf32> to vector<1x1x128xf32>
    %c0_10 = arith.constant 0 : index
    %c0_11 = arith.constant 0 : index
    %c0_12 = arith.constant 0 : index
    %12 = vector.load %arg5[%c0_10, %c0_11, %c0_12] : memref<1x1x128xf32, #tpu.memory_space<vmem>>, vector<1x1x128xf32>
    tpu.vector_store %arg5[%c0_10, %c0_11, %c0_12], %11 {strides = array<i32>} : memref<1x1x128xf32, #tpu.memory_space<vmem>>, vector<1x1x128xf32>,
    return
  }
  func.func @transform_0(%arg0: i32) -> (i32, i32) {
    %c0_i32 = arith.constant 0 : i32
    %c0_i32_0 = arith.constant 0 : i32
    return %arg0, %c0_i32 : i32, i32
  }
  func.func @transform_1(%arg0: i32) -> (i32, i32) {
    %c0_i32 = arith.constant 0 : i32
    %c0_i32_0 = arith.constant 0 : i32
    %c0_i32_1 = arith.constant 0 : i32
    return %c0_i32, %c0_i32_0 : i32, i32
  }
  func.func @transform_2(%arg0: i32) -> (i32, i32) {
    %c0_i32 = arith.constant 0 : i32
    %c0_i32_0 = arith.constant 0 : i32
    return %arg0, %c0_i32 : i32, i32
  }
  func.func @transform_3(%arg0: i32) -> (i32, i32, i32) {
    %c0_i32 = arith.constant 0 : i32
    %c0_i32_0 = arith.constant 0 : i32
    %c0_i32_1 = arith.constant 0 : i32
    return %arg0, %c0_i32, %c0_i32_0 : i32, i32, i32
  }
  func.func @transform_4(%arg0: i32) -> (i32, i32, i32) {
    %c0_i32 = arith.constant 0 : i32
    %c0_i32_0 = arith.constant 0 : i32
    %c0_i32_1 = arith.constant 0 : i32
    return %arg0, %c0_i32, %c0_i32_0 : i32, i32, i32
  }
}

module attributes {stable_mosaic.version = 11 : i64} {
  func.func @_bn_lrelu_kernel(%arg0: i32, %arg1: memref<128x128xf32, #tpu.memory_space<vmem>>, %arg2: memref<1x128xf32, #tpu.memory_space<vmem>>, %arg3: memref<1x128xf32, #tpu.memory_space<vmem>>, %arg4: memref<128x128xf32, #tpu.memory_space<vmem>>) attributes {dimension_semantics = [#tpu.dimension_semantics<parallel>], iteration_bounds = array<i64: 1>, scalar_prefetch = 0 : i64, scratch_operands = 0 : i64, tpu.core_type = #tpu.core_type<tc>, window_params = [{transform_indices = @transform_0, window_bounds = array<i64: 128, 128>}, {pipeline_mode = #tpu.pipeline_mode<synchronous>, transform_indices = @transform_1, window_bounds = array<i64: 1, 128>}, {pipeline_mode = #tpu.pipeline_mode<synchronous>, transform_indices = @transform_2, window_bounds = array<i64: 1, 128>}, {transform_indices = @transform_3, window_bounds = array<i64: 128, 128>}]} {
    %c0 = arith.constant 0 : index
    %c0_0 = arith.constant 0 : index
    %0 = vector.load %arg1[%c0, %c0_0] : memref<128x128xf32, #tpu.memory_space<vmem>>, vector<128x128xf32>
    %c0_1 = arith.constant 0 : index
    %c0_2 = arith.constant 0 : index
    %1 = vector.load %arg2[%c0_1, %c0_2] : memref<1x128xf32, #tpu.memory_space<vmem>>, vector<1x128xf32>
    %2 = vector.broadcast %1 : vector<1x128xf32> to vector<128x128xf32>
    %3 = arith.mulf %0, %2 : vector<128x128xf32>
    %c0_3 = arith.constant 0 : index
    %c0_4 = arith.constant 0 : index
    %4 = vector.load %arg3[%c0_3, %c0_4] : memref<1x128xf32, #tpu.memory_space<vmem>>, vector<1x128xf32>
    %5 = vector.broadcast %4 : vector<1x128xf32> to vector<128x128xf32>
    %6 = arith.addf %3, %5 : vector<128x128xf32>
    %cst = arith.constant 0.000000e+00 : f32
    %7 = vector.broadcast %cst : f32 to vector<128x128xf32>
    %8 = arith.cmpf ogt, %6, %7 : vector<128x128xf32>
    %cst_5 = arith.constant 2.000000e-01 : f32
    %9 = vector.broadcast %cst_5 : f32 to vector<128x128xf32>
    %10 = arith.mulf %9, %6 : vector<128x128xf32>
    %11 = arith.select %8, %6, %10 : vector<128x128xi1>, vector<128x128xf32>
    %c0_6 = arith.constant 0 : index
    %c0_7 = arith.constant 0 : index
    %12 = vector.load %arg4[%c0_6, %c0_7] : memref<128x128xf32, #tpu.memory_space<vmem>>, vector<128x128xf32>
    tpu.vector_store %arg4[%c0_6, %c0_7], %11 {strides = array<i32>} : memref<128x128xf32, #tpu.memory_space<vmem>>, vector<128x128xf32>,
    return
  }
  func.func @transform_0(%arg0: i32) -> (i32, i32) {
    %c0_i32 = arith.constant 0 : i32
    %c0_i32_0 = arith.constant 0 : i32
    return %arg0, %c0_i32 : i32, i32
  }
  func.func @transform_1(%arg0: i32) -> (i32, i32) {
    %c0_i32 = arith.constant 0 : i32
    %c0_i32_0 = arith.constant 0 : i32
    %c0_i32_1 = arith.constant 0 : i32
    return %c0_i32, %c0_i32_0 : i32, i32
  }
  func.func @transform_2(%arg0: i32) -> (i32, i32) {
    %c0_i32 = arith.constant 0 : i32
    %c0_i32_0 = arith.constant 0 : i32
    %c0_i32_1 = arith.constant 0 : i32
    return %c0_i32, %c0_i32_0 : i32, i32
  }
  func.func @transform_3(%arg0: i32) -> (i32, i32) {
    %c0_i32 = arith.constant 0 : i32
    %c0_i32_0 = arith.constant 0 : i32
    return %arg0, %c0_i32 : i32, i32
  }
}

</mosaic_0001>

<bundles_post_ra>
// kernel: _forward.3
= control target key start
LH: loop header
LB: loop body
LE: loop exit
PB: predicated region body
PF: predicated region fallthrough
CT: control target
= control target key end

     0   :  { %s305_s0 = inlined_call_operand.vmem [shape: f32[128,128], index: 0, kind: input, shape index: {}]   ;;  %s306_s1 = inlined_call_operand.vmem [shape: f32[1,128], index: 1, kind: input, shape index: {}]   ;;  %s307_s2 = inlined_call_operand.vmem [shape: f32[1,128], index: 2, kind: input, shape index: {}]   ;;  %s308_s3 = inlined_call_operand.vmem [shape: f32[128,128], index: 3, kind: output, shape index: {}]  }
   0x1   :  { %v14_v0 = vld [vmem:[%s305_s0] sm:$0xff]  ;;  %v15_v4 = vld [vmem:[%s305_s0 + $0x8] sm:$0xff]  ;;  %v16_v5 = vld [vmem:[%s305_s0 + $0x10] sm:$0xff] }
   0x2   :  { %v172_v1 = vld [vmem:[%s306_s1] ss:$0 sm:$0xff]  ;;  %v17_v6 = vld [vmem:[%s305_s0 + $0x18] sm:$0xff]  ;;  %v19_v11 = vld [vmem:[%s305_s0 + $0x28] sm:$0xff] }
   0x3   :  { %v177_v2 = vld [vmem:[%s307_s2] ss:$0 sm:$0xff]  ;;  %v37_v3 = vmul.f32 %v172_v1, %v14_v0  ;;  %v38_v7 = vmul.f32 %v172_v1, %v15_v4  ;;  %v39_v8 = vmul.f32 %v172_v1, %v16_v5  ;;  %v40_v9 = vmul.f32 %v172_v1, %v17_v6  ;;  %v20_v12 = vld [vmem:[%s305_s0 + $0x30] sm:$0xff]  ;;  %v21_v17 = vld [vmem:[%s305_s0 + $0x38] sm:$0xff] }
   0x4   :  { %v18_v10 = vld [vmem:[%s305_s0 + $0x20] sm:$0xff]  ;;  %v42_v15 = vmul.f32 %v172_v1, %v19_v11  ;;  %v43_v16 = vmul.f32 %v172_v1, %v20_v12  ;;  %v44_v21 = vmul.f32 %v172_v1, %v21_v17  ;;  %v23_v30 = vld [vmem:[%s305_s0 + $0x48] sm:$0xff]  ;;  %v24_v31 = vld [vmem:[%s305_s0 + $0x50] sm:$0xff] }
   0x5   :  { %v60_v13 = vadd.f32 %v177_v2, %v37_v3  ;;  %v41_v14 = vmul.f32 %v172_v1, %v18_v10  ;;  %v61_v18 = vadd.f32 %v177_v2, %v38_v7  ;;  %v62_v19 = vadd.f32 %v177_v2, %v39_v8  ;;  %v22_v25 = vld [vmem:[%s305_s0 + $0x40] sm:$0xff]  ;;  %v25_v43 = vld [vmem:[%s305_s0 + $0x58] sm:$0xff]  ;;  %v27_v45 = vld [vmem:[%s305_s0 + $0x68] sm:$0xff] }
   0x6   :  { %v63_v20 = vadd.f32 %v177_v2, %v40_v9  ;;  %v65_v24 = vadd.f32 %v177_v2, %v42_v15  ;;  %v66_v37 = vadd.f32 %v177_v2, %v43_v16  ;;  %v67_v38 = vadd.f32 %v177_v2, %v44_v21  ;;  %v26_v44 = vld [vmem:[%s305_s0 + $0x60] sm:$0xff]  ;;  %v28_v56 = vld [vmem:[%s305_s0 + $0x70] sm:$0xff]  ;;  %v29_v4 = vld [vmem:[%s305_s0 + $0x78] sm:$0xff] }
   0x7   :  { %vm76_vm0 = vcmp.gt.f32.partialorder %v60_v13, 0.0  ;;  %v92_v22 = vmul.f32 0.2, %v60_v13  ;;  %v64_v23 = vadd.f32 %v177_v2, %v41_v14  ;;  %vm77_vm1 = vcmp.gt.f32.partialorder %v61_v18, 0.0 }
   0x8   :  { %v93_v26 = vmul.f32 0.2, %v61_v18  ;;  %vm78_vm2 = vcmp.gt.f32.partialorder %v62_v19, 0.0  ;;  %v94_v27 = vmul.f32 0.2, %v62_v19  ;;  %vm79_vm3 = vcmp.gt.f32.partialorder %v63_v20, 0.0 }
   0x9   :  { %v108_v28 = vsel %vm76_vm0, %v60_v13, %v92_v22  ;;  %v95_v29 = vmul.f32 0.2, %v63_v20  ;;  %vm80_vm4 = vcmp.gt.f32.partialorder %v64_v23, 0.0  ;;  %v96_v34 = vmul.f32 0.2, %v64_v23 }
   0xa   :  { %124 = vst [vmem:[%s308_s3] sm:$0xff] %v108_v28  ;;  %v109_v32 = vsel %vm77_vm1, %v61_v18, %v93_v26  ;;  %v110_v33 = vsel %vm78_vm2, %v62_v19, %v94_v27  ;;  %vm81_vm5 = vcmp.gt.f32.partialorder %v65_v24, 0.0  ;;  %v97_v36 = vmul.f32 0.2, %v65_v24 }
   0xb   :  { %125 = vst [vmem:[%s308_s3 + $0x8] sm:$0xff] %v109_v32  ;;  %126 = vst [vmem:[%s308_s3 + $0x10] sm:$0xff] %v110_v33  ;;  %v111_v35 = vsel %vm79_vm3, %v63_v20, %v95_v29  ;;  %v112_v39 = vsel %vm80_vm4, %v64_v23, %v96_v34  ;;  %v45_v40 = vmul.f32 %v172_v1, %v22_v25  ;;  %vm82_vm6 = vcmp.gt.f32.partialorder %v66_v37, 0.0 }
   0xc   :  { %127 = vst [vmem:[%s308_s3 + $0x18] sm:$0xff] %v111_v35  ;;  %v46_v41 = vmul.f32 %v172_v1, %v23_v30  ;;  %v47_v42 = vmul.f32 %v172_v1, %v24_v31  ;;  %128 = vst [vmem:[%s308_s3 + $0x20] sm:$0xff] %v112_v39  ;;  %v113_v46 = vsel %vm81_vm5, %v65_v24, %v97_v36  ;;  %v98_v47 = vmul.f32 0.2, %v66_v37 }
   0xd   :  { %vm83_vm7 = vcmp.gt.f32.partialorder %v67_v38, 0.0  ;;  %129 = vst [vmem:[%s308_s3 + $0x28] sm:$0xff] %v113_v46  ;;  %v99_v48 = vmul.f32 0.2, %v67_v38  ;;  %v68_v49 = vadd.f32 %v177_v2, %v45_v40  ;;  %v48_v53 = vmul.f32 %v172_v1, %v25_v43 }
   0xe   :  { %v69_v50 = vadd.f32 %v177_v2, %v46_v41  ;;  %v70_v51 = vadd.f32 %v177_v2, %v47_v42  ;;  %v114_v52 = vsel %vm82_vm6, %v66_v37, %v98_v47  ;;  %v49_v54 = vmul.f32 %v172_v1, %v26_v44 }
   0xf   :  { %v50_v55 = vmul.f32 %v172_v1, %v27_v45  ;;  %130 = vst [vmem:[%s308_s3 + $0x30] sm:$0xff] %v114_v52  ;;  %v115_v57 = vsel %vm83_vm7, %v67_v38, %v99_v48  ;;  %vm84_vm8 = vcmp.gt.f32.partialorder %v68_v49, 0.0  ;;  %v100_v58 = vmul.f32 0.2, %v68_v49 }
  0x10   :  { %vm85_vm9 = vcmp.gt.f32.partialorder %v69_v50, 0.0  ;;  %131 = vst [vmem:[%s308_s3 + $0x38] sm:$0xff] %v115_v57  ;;  %v101_v59 = vmul.f32 0.2, %v69_v50  ;;  %vm86_vm10 = vcmp.gt.f32.partialorder %v70_v51, 0.0  ;;  %v71_v61 = vadd.f32 %v177_v2, %v48_v53 }
  0x11   :  { %v102_v60 = vmul.f32 0.2, %v70_v51  ;;  %v116_v62 = vsel %vm84_vm8, %v68_v49, %v100_v58  ;;  %v72_v63 = vadd.f32 %v177_v2, %v49_v54  ;;  %v73_v0 = vadd.f32 %v177_v2, %v50_v55 }
  0x12   :  { %v51_v3 = vmul.f32 %v172_v1, %v28_v56  ;;  %132 = vst [vmem:[%s308_s3 + $0x40] sm:$0xff] %v116_v62  ;;  %v117_v5 = vsel %vm85_vm9, %v69_v50, %v101_v59  ;;  %vm87_vm11 = vcmp.gt.f32.partialorder %v71_v61, 0.0  ;;  %v103_v7 = vmul.f32 0.2, %v71_v61 }
  0x13   :  { %v118_v6 = vsel %vm86_vm10, %v70_v51, %v102_v60  ;;  %133 = vst [vmem:[%s308_s3 + $0x48] sm:$0xff] %v117_v5  ;;  %vm88_vm12 = vcmp.gt.f32.partialorder %v72_v63, 0.0  ;;  %v104_v8 = vmul.f32 0.2, %v72_v63  ;;  %vm89_vm13 = vcmp.gt.f32.partialorder %v73_v0, 0.0 }
  0x14   :  { %134 = vst [vmem:[%s308_s3 + $0x50] sm:$0xff] %v118_v6  ;;  %v105_v9 = vmul.f32 0.2, %v73_v0  ;;  %v119_v10 = vsel %vm87_vm11, %v71_v61, %v103_v7  ;;  %v74_v11 = vadd.f32 %v177_v2, %v51_v3  ;;  %v52_v12 = vmul.f32 %v172_v1, %v29_v4 }
  0x15   :  { %135 = vst [vmem:[%s308_s3 + $0x58] sm:$0xff] %v119_v10  ;;  %v120_v13 = vsel %vm88_vm12, %v72_v63, %v104_v8 }
  0x16   :  { %v121_v14 = vsel %vm89_vm13, %v73_v0, %v105_v9  ;;  %136 = vst [vmem:[%s308_s3 + $0x60] sm:$0xff] %v120_v13  ;;  %vm90_vm14 = vcmp.gt.f32.partialorder %v74_v11, 0.0  ;;  %v106_v15 = vmul.f32 0.2, %v74_v11  ;;  %v75_v16 = vadd.f32 %v177_v2, %v52_v12 }
  0x17   :  { %137 = vst [vmem:[%s308_s3 + $0x68] sm:$0xff] %v121_v14 }
  0x18   :  { %v122_v17 = vsel %vm90_vm14, %v74_v11, %v106_v15  ;;  %vm91_vm15 = vcmp.gt.f32.partialorder %v75_v16, 0.0  ;;  %v107_v1 = vmul.f32 0.2, %v75_v16 }
  0x19   :  { %138 = vst [vmem:[%s308_s3 + $0x70] sm:$0xff] %v122_v17 }
  0x1a   :  { %v123_v18 = vsel %vm91_vm15, %v75_v16, %v107_v1 }
  0x1b   :  { %139 = vst [vmem:[%s308_s3 + $0x78] sm:$0xff] %v123_v18 }

// kernel: _forward.2
= control target key start
LH: loop header
LB: loop body
LE: loop exit
PB: predicated region body
PF: predicated region fallthrough
CT: control target
= control target key end

     0   :  { %vm103_vm0 = vcmask 523264   ;;  %s512_s1 = inlined_call_operand.vmem [shape: bf16[64,128], index: 1, kind: input, shape index: {}]   ;;  %s513_s0 = inlined_call_operand.vmem [shape: bf16[128,64], index: 0, kind: input, shape index: {}]   ;;  %s514_s2 = inlined_call_operand.vmem [shape: f32[128,128], index: 2, kind: output, shape index: {0}]   ;;  %s515_s3 = inlined_call_operand.vmem [shape: f32[1,1,128], index: 3, kind: output, shape index: {1}]   ;;  %s516_s4 = inlined_call_operand.vmem [shape: f32[1,1,128], index: 4, kind: output, shape index: {2}]  }
   0x1   :  { %v377_v0 = vld [vmem:[%s512_s1] sm:$0xff]   ;;  %v378_v1 = vld [vmem:[%s512_s1 + $0x8] sm:$0xff]   ;;  %v379_v2 = vld [vmem:[%s512_s1 + $0x10] sm:$0xff]  }
   0x2   :  { %345 = vmatprep.subr.bf16.mxu0 %v377_v0  ;;  %369 = vmatprep.subr.bf16.mxu1 %v377_v0  ;;  %v381_v3 = vld [vmem:[%s513_s0] sm:$0xff]   ;;  %v380_v4 = vld [vmem:[%s512_s1 + $0x18] sm:$0xff]   ;;  %v382_v6 = vld [vmem:[%s513_s0 + $0x8] sm:$0xff]  }
   0x3   :  { %346 = vmatpush3.bf16.msra.mxu0 %v377_v0  ;;  %373 = vmatpush3.bf16.msra.mxu1 %v377_v0  ;;  %v385_v5 = vld [vmem:[%s513_s0 + $0x20] sm:$0xff]   ;;  %v386_v7 = vld [vmem:[%s513_s0 + $0x28] sm:$0xff]   ;;  %v383_v8 = vld [vmem:[%s513_s0 + $0x10] sm:$0xff]  }
   0x4   :  { %347 = vmatprep.subr.bf16.mxu0 %v378_v1  ;;  %370 = vmatprep.subr.bf16.mxu1 %v378_v1  ;;  %v387_v9 = vld [vmem:[%s513_s0 + $0x30] sm:$0xff]   ;;  %v384_v10 = vld [vmem:[%s513_s0 + $0x18] sm:$0xff]  }
   0x5   :  { %353 = vmatprep.mubr.msk.bf16.mxu0 %vm103_vm0, %v381_v3  ;;  %361 = vmatprep.mubr.msk.bf16.mxu1 %vm103_vm0, %v385_v5  ;;  %v388_v11 = vld [vmem:[%s513_s0 + $0x38] sm:$0xff]  }
   0x7   :  { %348 = vmatpush3.bf16.msra.mxu0 %v378_v1  ;;  %374 = vmatpush3.bf16.msra.mxu1 %v378_v1 }
   0x8   :  { %349 = vmatprep.subr.bf16.mxu0 %v379_v2  ;;  %371 = vmatprep.subr.bf16.mxu1 %v379_v2 }
   0xb   :  { %350 = vmatpush3.bf16.msra.mxu0 %v379_v2  ;;  %375 = vmatpush3.bf16.msra.mxu1 %v379_v2 }
   0xc   :  { %351 = vmatprep.subr.bf16.mxu0 %v380_v4  ;;  %372 = vmatprep.subr.bf16.mxu1 %v380_v4 }
   0xf   :  { %352 = vmatpush3.bf16.msra.mxu0 %v380_v4  ;;  %376 = vmatpush3.bf16.msra.mxu1 %v380_v4 }
  0x12   :  { %354 = vmatmul.mubr.msk.bf16.vlgmr.msra.gmra.mrb[0].mxu0 %vm103_vm0, %v382_v6  ;;  %362 = vmatmul.mubr.msk.bf16.vlgmr.msra.gmra.mrb[0].mxu1 %vm103_vm0, %v386_v7 }
  0x13   :  { %357 = vmatprep.mubr.msk.bf16.mxu0 %vm103_vm0, %v383_v8  ;;  %365 = vmatprep.mubr.msk.bf16.mxu1 %vm103_vm0, %v387_v9 }
  0x1a   :  { %358 = vmatmul.mubr.msk.bf16.gmra.mrb[4].mxu0 %vm103_vm0, %v384_v10  ;;  %366 = vmatmul.mubr.msk.bf16.gmra.mrb[4].mxu1 %vm103_vm0, %v388_v11 }
  0xe5   :  { %v355_v12 = vpop.f32.mrb[0].mxu0  ;;  %v363_v13 = vpop.f32.mrb[0].mxu1 }
  0xe6   :  { %227 = vst [vmem:[%s514_s2 + $0x10] sm:$0xff] %v355_v12  ;;  %v162_v14 = vpop.f32.mrb[1].mxu0  ;;  %235 = vst [vmem:[%s514_s2 + $0x50] sm:$0xff] %v363_v13  ;;  %v194_v15 = vpop.f32.mrb[1].mxu1  ;;  %v264_v23 = vmul.f32 %v355_v12, %v355_v12  ;;  %v272_v55 = vmul.f32 %v363_v13, %v363_v13 }
  0xe7   :  { %225 = vst [vmem:[%s514_s2] sm:$0xff] %v162_v14  ;;  %v356_v16 = vpop.f32.mrb[2].mxu0  ;;  %233 = vst [vmem:[%s514_s2 + $0x40] sm:$0xff] %v194_v15  ;;  %v364_v17 = vpop.f32.mrb[2].mxu1  ;;  %v262_v20 = vmul.f32 %v162_v14, %v162_v14  ;;  %v270_v49 = vmul.f32 %v194_v15, %v194_v15 }
  0xe8   :  { %228 = vst [vmem:[%s514_s2 + $0x18] sm:$0xff] %v356_v16  ;;  %v165_v18 = vpop.f32.mrb[3].mxu0  ;;  %236 = vst [vmem:[%s514_s2 + $0x58] sm:$0xff] %v364_v17  ;;  %v197_v19 = vpop.f32.mrb[3].mxu1  ;;  %v265_v26 = vmul.f32 %v356_v16, %v356_v16  ;;  %v273_v58 = vmul.f32 %v364_v17, %v364_v17 }
  0xe9   :  { %226 = vst [vmem:[%s514_s2 + $0x8] sm:$0xff] %v165_v18  ;;  %v241_v21 = vadd.f32 %v165_v18, %v162_v14  ;;  %v263_v22 = vmul.f32 %v165_v18, %v165_v18  ;;  %234 = vst [vmem:[%s514_s2 + $0x48] sm:$0xff] %v197_v19  ;;  %v271_v54 = vmul.f32 %v197_v19, %v197_v19 }
  0xeb   :  { %v242_v24 = vadd.f32 %v355_v12, %v241_v21  ;;  %v278_v25 = vadd.f32 %v263_v22, %v262_v20 }
  0xed   :  { %v279_v27 = vadd.f32 %v278_v25, %v264_v23  ;;  %v359_v28 = vpop.f32.mrb[4].mxu0  ;;  %v243_v29 = vadd.f32 %v356_v16, %v242_v24  ;;  %v367_v30 = vpop.f32.mrb[4].mxu1 }
  0xee   :  { %231 = vst [vmem:[%s514_s2 + $0x30] sm:$0xff] %v359_v28  ;;  %v178_v31 = vpop.f32.mrb[5].mxu0  ;;  %239 = vst [vmem:[%s514_s2 + $0x70] sm:$0xff] %v367_v30  ;;  %v210_v32 = vpop.f32.mrb[5].mxu1  ;;  %v268_v43 = vmul.f32 %v359_v28, %v359_v28  ;;  %v276_v3 = vmul.f32 %v367_v30, %v367_v30 }
  0xef   :  { %229 = vst [vmem:[%s514_s2 + $0x20] sm:$0xff] %v178_v31  ;;  %v244_v33 = vadd.f32 %v243_v29, %v178_v31  ;;  %v266_v34 = vmul.f32 %v178_v31, %v178_v31  ;;  %v280_v35 = vadd.f32 %v279_v27, %v265_v26  ;;  %v360_v36 = vpop.f32.mrb[6].mxu0  ;;  %237 = vst [vmem:[%s514_s2 + $0x60] sm:$0xff] %v210_v32  ;;  %v368_v37 = vpop.f32.mrb[6].mxu1 }
  0xf0   :  { %232 = vst [vmem:[%s514_s2 + $0x38] sm:$0xff] %v360_v36  ;;  %v181_v38 = vpop.f32.mrb[7].mxu0  ;;  %240 = vst [vmem:[%s514_s2 + $0x78] sm:$0xff] %v368_v37  ;;  %v213_v39 = vpop.f32.mrb[7].mxu1  ;;  %v269_v46 = vmul.f32 %v360_v36, %v360_v36  ;;  %v274_v61 = vmul.f32 %v210_v32, %v210_v32  ;;  %v277_v6 = vmul.f32 %v368_v37, %v368_v37 }
  0xf1   :  { %v281_v40 = vadd.f32 %v280_v35, %v266_v34  ;;  %230 = vst [vmem:[%s514_s2 + $0x28] sm:$0xff] %v181_v38  ;;  %v245_v41 = vadd.f32 %v244_v33, %v181_v38  ;;  %v267_v42 = vmul.f32 %v181_v38, %v181_v38  ;;  %238 = vst [vmem:[%s514_s2 + $0x68] sm:$0xff] %v213_v39 }
  0xf2   :  { %v275_v2 = vmul.f32 %v213_v39, %v213_v39 }
  0xf3   :  { %v246_v44 = vadd.f32 %v359_v28, %v245_v41  ;;  %v282_v45 = vadd.f32 %v281_v40, %v267_v42 }
  0xf5   :  { %v283_v47 = vadd.f32 %v282_v45, %v268_v43  ;;  %v247_v48 = vadd.f32 %v360_v36, %v246_v44 }
  0xf7   :  { %v248_v50 = vadd.f32 %v247_v48, %v194_v15  ;;  %v284_v51 = vadd.f32 %v283_v47, %v269_v46 }
  0xf9   :  { %v285_v52 = vadd.f32 %v284_v51, %v270_v49  ;;  %v249_v53 = vadd.f32 %v248_v50, %v197_v19 }
  0xfb   :  { %v250_v56 = vadd.f32 %v363_v13, %v249_v53  ;;  %v286_v57 = vadd.f32 %v285_v52, %v271_v54 }
  0xfd   :  { %v287_v59 = vadd.f32 %v286_v57, %v272_v55  ;;  %v251_v60 = vadd.f32 %v364_v17, %v250_v56 }
  0xff   :  { %v252_v62 = vadd.f32 %v251_v60, %v210_v32  ;;  %v288_v63 = vadd.f32 %v287_v59, %v273_v58 }
 0x101   :  { %v289_v0 = vadd.f32 %v288_v63, %v274_v61  ;;  %v253_v1 = vadd.f32 %v252_v62, %v213_v39 }
 0x103   :  { %v254_v4 = vadd.f32 %v367_v30, %v253_v1  ;;  %v290_v5 = vadd.f32 %v289_v0, %v275_v2 }
 0x105   :  { %v255_v7 = vadd.f32 %v368_v37, %v254_v4  ;;  %v291_v8 = vadd.f32 %v290_v5, %v276_v3 }
 0x107   :  { %v256_v9 = vrot.slane %v255_v7, 4  ;;  %v292_v10 = vadd.f32 %v291_v8, %v277_v6 }
 0x109   :  { %v257_v11 = vadd.f32 %v256_v9, %v255_v7  ;;  %v293_v12 = vrot.slane %v292_v10, 4 }
 0x10b   :  { %v258_v13 = vrot.slane %v257_v11, 2  ;;  %v294_v14 = vadd.f32 %v293_v12, %v292_v10 }
 0x10d   :  { %v259_v15 = vadd.f32 %v258_v13, %v257_v11  ;;  %v295_v16 = vrot.slane %v294_v14, 2 }
 0x10f   :  { %v260_v17 = vrot.slane %v259_v15, 1  ;;  %v296_v18 = vadd.f32 %v295_v16, %v294_v14 }
 0x111   :  { %v261_v19 = vadd.f32 %v260_v17, %v259_v15  ;;  %v297_v20 = vrot.slane %v296_v18, 1 }
 0x113   :  { %v298_v21 = vadd.f32 %v297_v20, %v296_v18  ;;  %299 = vst [vmem:[%s515_s3] sm:$0x1] %v261_v19 }
 0x115   :  { %300 = vst [vmem:[%s516_s4] sm:$0x1] %v298_v21 }

</bundles_post_ra>
